<compile_context>
chip_gen: v7x
topology: tpu7x:2x2x1
jax: 0.10.0
libtpu: 0.0.40
codegen_flags: <defaults>
</compile_context>

<pallas_src>
import functools

import jax
import jax.numpy as jnp
from jax.experimental import pallas as pl
from jax.experimental.pallas import tpu as pltpu


# --------------------------------------------------------------------------
# Pallas kernels
# --------------------------------------------------------------------------

def _matmul_bias_kernel(x_ref, w_ref, b_ref, o_ref, acc_ref, *, apply_relu):
    """Tiled matmul (bf16 operands, f32 accumulation); bias + optional ReLU fused."""
    k = pl.program_id(2)

    @pl.when(k == 0)
    def _():
        acc_ref[...] = jnp.zeros_like(acc_ref)

    acc_ref[...] += jnp.dot(x_ref[...], w_ref[...],
                            preferred_element_type=jnp.float32)

    @pl.when(k == pl.num_programs(2) - 1)
    def _():
        out = acc_ref[...] + b_ref[...]
        if apply_relu:
            out = jnp.maximum(out, 0.0)
        o_ref[...] = out.astype(o_ref.dtype)


def _conv3x3_row_kernel(x0_ref, x1_ref, x2_ref, w_ref, b_ref, o_ref, *,
                        out_w, apply_relu):
    """Implicit-GEMM 3x3 conv for one output row.

    x0/x1/x2: the three padded input rows (kh taps), each (Wp, Cin) bf16.
    w_ref:    (9, Cin, tn) bf16, tap-major (kh*3 + kw).
    Accumulates 9 MXU dots in f32, then fused bias + ReLU.
    """
    rows = (x0_ref[...], x1_ref[...], x2_ref[...])
    acc = jnp.zeros((out_w, o_ref.shape[-1]), jnp.float32)
    for r in range(3):
        row = rows[r]
        for dj in range(3):
            acc += jnp.dot(row[dj:dj + out_w, :], w_ref[3 * r + dj],
                           preferred_element_type=jnp.float32)
    acc = acc + b_ref[...]
    if apply_relu:
        acc = jnp.maximum(acc, 0.0)
    o_ref[...] = acc.astype(o_ref.dtype)


def _pool_reduce_kernel(x_ref, o_ref, *, op, scale):
    """Reduce over the leading (window-offset) axis: max or mean."""
    acc = x_ref[0]
    for i in range(1, x_ref.shape[0]):
        nxt = x_ref[i]
        acc = jnp.maximum(acc, nxt) if op == "max" else acc + nxt
    if op == "avg":
        acc = acc * scale
    o_ref[...] = acc


# --------------------------------------------------------------------------
# Wrappers around pallas_call
# --------------------------------------------------------------------------

def _round_up(x, m):
    return (x + m - 1) // m * m


def linear_pallas(x, w, b, *, relu=False):
    """y = x @ w + b (optionally ReLU).  x: (M, K), w: (K, N), b: (N,).

    Operands are cast to bf16 (MXU-native on v5e/v6e/v7x); accumulation is f32.
    Tiles are chosen large (tn up to 512, tk up to ~4096) so the grid has tens
    of steps, with the bf16 weight tile capped ~4 MiB so the double-buffered
    pipeline stays well inside scoped VMEM on all three generations.
    """
    M, K = x.shape
    K2, N = w.shape
    assert K == K2 and b.shape == (N,)

    tm = min(128, _round_up(M, 8))
    Mp = _round_up(M, tm)
    Np = _round_up(N, 128)
    tn = next(t for t in (512, 256, 128) if Np % t == 0)
    Kp = _round_up(K, 128)

    max_tk = max(128, (4 * 1024 * 1024) // (2 * tn))   # bf16 weight tile budget
    tk = 128
    for cand in (4096, 3584, 3072, 2560, 2048, 1792, 1536, 1280, 1024,
                 896, 768, 640, 512, 384, 256, 128):
        if cand <= max_tk and Kp % cand == 0:
            tk = cand
            break

    xp = x if (Mp == M and Kp == K) else jnp.pad(x, ((0, Mp - M), (0, Kp - K)))
    wp = w if (Kp == K and Np == N) else jnp.pad(w, ((0, Kp - K), (0, Np - N)))
    xp = xp.astype(jnp.bfloat16)
    wp = wp.astype(jnp.bfloat16)
    bp = (b if Np == N else jnp.pad(b, (0, Np - N)))
    bp = bp.reshape(1, Np).astype(jnp.float32)

    grid = (Mp // tm, Np // tn, Kp // tk)
    out = pl.pallas_call(
        functools.partial(_matmul_bias_kernel, apply_relu=relu),
        out_shape=jax.ShapeDtypeStruct((Mp, Np), jnp.float32),
        grid_spec=pltpu.PrefetchScalarGridSpec(
            num_scalar_prefetch=0,
            grid=grid,
            in_specs=[
                pl.BlockSpec((tm, tk), lambda i, j, k: (i, k)),
                pl.BlockSpec((tk, tn), lambda i, j, k: (k, j)),
                pl.BlockSpec((1, tn), lambda i, j, k: (0, j)),
            ],
            out_specs=pl.BlockSpec((tm, tn), lambda i, j, k: (i, j)),
            scratch_shapes=[pltpu.VMEM((tm, tn), jnp.float32)],
        ),
        compiler_params=pltpu.CompilerParams(
            dimension_semantics=("parallel", "parallel", "arbitrary")),
    )(xp, wp, bp)
    return out[:M, :N]


def pool2d_pallas(x, kh, kw, op):
    """Non-overlapping (kh, kw) pooling with stride (kh, kw).  x: NHWC.

    The operand is exposed as (kh*kw, R, 128) lane-dense slabs (falls back to
    (kh*kw, M, C) if not 128-divisible), tiled and pipelined over rows; the
    offset reduction (max / mean) runs in the Pallas kernel.
    """
    N, H, W, C = x.shape
    assert H % kh == 0 and W % kw == 0
    Ho, Wo = H // kh, W // kw
    K = kh * kw

    # Glue: expose each of the kh*kw window offsets as a leading axis.
    xr = x.reshape(N, Ho, kh, Wo, kw, C).transpose(2, 4, 0, 1, 3, 5)
    total = N * Ho * Wo * C
    if total % 128 == 0:
        R, L = total // 128, 128            # lane-dense: unmasked full-width stores
    else:
        R, L = N * Ho * Wo, C
    xr = xr.reshape(K, R, L)

    tr = R if R <= 512 else 512
    Rp = _round_up(R, tr)
    if Rp != R:
        # Padded rows produce garbage outputs that are sliced off below
        # (reduction is purely row-wise over the leading offset axis).
        xr = jnp.pad(xr, ((0, 0), (0, Rp - R), (0, 0)))

    out = pl.pallas_call(
        functools.partial(_pool_reduce_kernel, op=op, scale=1.0 / K),
        out_shape=jax.ShapeDtypeStruct((Rp, L), x.dtype),
        grid=(Rp // tr,),
        in_specs=[pl.BlockSpec((K, tr, L), lambda i: (0, i, 0))],
        out_specs=pl.BlockSpec((tr, L), lambda i: (i, 0)),
        compiler_params=pltpu.CompilerParams(
            dimension_semantics=("parallel",)),
    )(xr)
    return out[:R].reshape(N, Ho, Wo, C)


def _conv_x_index(j, n, h, *, r):
    return (n, h + r, 0, 0)


def _conv_w_index(j, n, h):
    return (0, 0, j)


def _conv_b_index(j, n, h):
    return (0, j)


def _conv_o_index(j, n, h):
    return (n, h, 0, j)


def conv3x3_relu_pallas(x, w9, b):
    """3x3 conv, stride 1, padding 1, fused ReLU — implicit GEMM.

    x:  (N, H, W, Cin) NHWC f32
    w9: (9, Cin, Cout) bf16, tap-major (kh*3 + kw)
    b:  (Cout,) f32

    No im2col materialization: each grid step DMAs the three padded tap rows
    for one output row straight from the NHWC activation via BlockSpec
    index_maps, and the (9, Cin, tn) weight block stays VMEM-resident across
    the inner (n, h) grid loop.
    """
    N, H, W, Cin = x.shape
    _, Cin2, Cout = w9.shape
    assert Cin == Cin2 and b.shape == (Cout,)

    # Pad channels up to a sublane multiple so the MXU contraction dim is sane.
    Cin_p = _round_up(Cin, 8)
    xp = jnp.pad(x, ((0, 0), (1, 1), (1, 1), (0, Cin_p - Cin))).astype(jnp.bfloat16)
    w9p = w9 if Cin_p == Cin else jnp.pad(w9, ((0, 0), (0, Cin_p - Cin), (0, 0)))
    w9p = w9p.astype(jnp.bfloat16)
    Wp = W + 2

    if Cout <= 512:
        tn = Cout
    else:
        tn = next(t for t in (512, 256, 128) if Cout % t == 0)
    b2 = b.reshape(1, Cout).astype(jnp.float32)

    grid = (Cout // tn, N, H)   # cout outermost -> weights resident over (n, h)
    in_specs = [
        pl.BlockSpec((None, None, Wp, Cin_p), functools.partial(_conv_x_index, r=0)),
        pl.BlockSpec((None, None, Wp, Cin_p), functools.partial(_conv_x_index, r=1)),
        pl.BlockSpec((None, None, Wp, Cin_p), functools.partial(_conv_x_index, r=2)),
        pl.BlockSpec((9, Cin_p, tn), _conv_w_index),
        pl.BlockSpec((1, tn), _conv_b_index),
    ]
    out_specs = pl.BlockSpec((None, None, W, tn), _conv_o_index)

    out = pl.pallas_call(
        functools.partial(_conv3x3_row_kernel, out_w=W, apply_relu=True),
        out_shape=jax.ShapeDtypeStruct((N, H, W, Cout), jnp.float32),
        grid=grid,
        in_specs=in_specs,
        out_specs=out_specs,
        compiler_params=pltpu.CompilerParams(
            dimension_semantics=("parallel", "parallel", "parallel")),
    )(xp, xp, xp, w9p, b2)
    return out


# --------------------------------------------------------------------------
# VGG module (parameters initialized like VGG._initialize_weights)
# --------------------------------------------------------------------------

class VGGPallas:
    """VGG: features -> AdaptiveAvgPool2d((7,7)) -> flatten -> classifier.

    Classifier mirrors the PyTorch module exactly:
      Linear(512*7*7, 4096) -> ReLU -> Dropout -> Linear(4096, 4096) -> ReLU
      -> Dropout -> Linear(4096, num_classes)
    """

    def __init__(self, key, cfg=(64, "M", 512), in_channels=3,
                 num_classes=10, hidden=4096, pooled_hw=(7, 7)):
        self.pooled_hw = pooled_hw
        keys = iter(jax.random.split(key, 2 * len(cfg) + 6))

        # features: Conv3x3(+ReLU) / MaxPool(2) stack, kaiming_normal fan_out.
        # Conv weights stored tap-major (9, Cin, Cout) in bf16 for the MXU.
        self.feature_layers = []
        c_in = in_channels
        for v in cfg:
            if v == "M":
                self.feature_layers.append("M")
            else:
                c_out = int(v)
                fan_out = c_out * 3 * 3
                std = (2.0 / fan_out) ** 0.5
                w = jax.random.normal(next(keys), (3, 3, c_in, c_out),
                                      jnp.float32) * std
                w9 = w.reshape(9, c_in, c_out).astype(jnp.bfloat16)
                b = jnp.zeros((c_out,), jnp.float32)          # bias init 0
                self.feature_layers.append((w9, b))
                c_in = c_out
        self.feat_channels = c_in

        # classifier: Linear weights ~ N(0, 0.01) stored bf16, biases 0 (f32).
        fin = self.feat_channels * pooled_hw[0] * pooled_hw[1]

        def lin(k, fan_in, fan_out_):
            w = (jax.random.normal(k, (fan_in, fan_out_), jnp.float32)
                 * 0.01).astype(jnp.bfloat16)
            return w, jnp.zeros((fan_out_,), jnp.float32)

        self.fc1_w, self.fc1_b = lin(next(keys), fin, hidden)
        self.fc2_w, self.fc2_b = lin(next(keys), hidden, hidden)
        self.fc3_w, self.fc3_b = lin(next(keys), hidden, num_classes)

    def __call__(self, x_nchw):
        # PyTorch input is NCHW -> internal NHWC
        x = jnp.transpose(x_nchw, (0, 2, 3, 1))

        # features
        for layer in self.feature_layers:
            if layer == "M":
                x = pool2d_pallas(x, 2, 2, "max")
            else:
                w9, b = layer
                x = conv3x3_relu_pallas(x, w9, b)

        # AdaptiveAvgPool2d((7,7)): uniform bins since H, W are multiples of 7.
        # TODO(synk): general adaptive pooling with non-uniform bins (H,W not
        # multiples of 7) is not implemented.
        N, H, W, C = x.shape
        assert H % self.pooled_hw[0] == 0 and W % self.pooled_hw[1] == 0
        x = pool2d_pallas(x, H // self.pooled_hw[0], W // self.pooled_hw[1], "avg")

        # torch.flatten(x, 1) on NCHW -> transpose back to NCHW ordering first.
        x = jnp.transpose(x, (0, 3, 1, 2)).reshape(x.shape[0], -1)

        # classifier (Dropout is identity in eval mode)
        # TODO(synk): training-mode stochastic Dropout omitted (eval semantics).
        x = linear_pallas(x, self.fc1_w, self.fc1_b, relu=True)
        x = linear_pallas(x, self.fc2_w, self.fc2_b, relu=True)
        x = linear_pallas(x, self.fc3_w, self.fc3_b, relu=False)
        return x


# --------------------------------------------------------------------------
# main
# --------------------------------------------------------------------------

if __name__ == "__main__":
    key = jax.random.PRNGKey(0)
    pkey, xkey = jax.random.split(key)

    num_classes = 10
    # Small feature stack ending at 512 channels so the classifier input is
    # exactly 512*7*7 = 25088 as hard-coded in the PyTorch module.
    model = VGGPallas(pkey, cfg=(64, "M", 512), in_channels=3,
                      num_classes=num_classes, hidden=4096, pooled_hw=(7, 7))

    # NCHW input, like the PyTorch module.  28x28 -> features -> 14x14 ->
    # adaptive avg pool -> 7x7.
    x = jax.random.normal(xkey, (2, 3, 28, 28), jnp.float32)

    out = model(x)
    out = jax.block_until_ready(out)
    assert out.shape == (2, num_classes)
    assert bool(jnp.all(jnp.isfinite(out)))
    print("KERNEL_OK")
</pallas_src>

<mosaic_0001>
module attributes {stable_mosaic.version = 11 : i64} {
  func.func @_conv3x3_row_kernel(%arg0: i32, %arg1: i32, %arg2: i32, %arg3: memref<1x1x30x8xbf16, #tpu.memory_space<vmem>>, %arg4: memref<1x1x30x8xbf16, #tpu.memory_space<vmem>>, %arg5: memref<1x1x30x8xbf16, #tpu.memory_space<vmem>>, %arg6: memref<9x8x64xbf16, #tpu.memory_space<vmem>>, %arg7: memref<1x64xf32, #tpu.memory_space<vmem>>, %arg8: memref<1x1x28x64xf32, #tpu.memory_space<vmem>>) attributes {dimension_semantics = [#tpu.dimension_semantics<parallel>, #tpu.dimension_semantics<parallel>, #tpu.dimension_semantics<parallel>], iteration_bounds = array<i64: 1, 2, 28>, scalar_prefetch = 0 : i64, scratch_operands = 0 : i64, tpu.core_type = #tpu.core_type<tc>, window_params = [{transform_indices = @transform_0, window_bounds = array<i64: 1, 1, 30, 8>}, {transform_indices = @transform_1, window_bounds = array<i64: 1, 1, 30, 8>}, {transform_indices = @transform_2, window_bounds = array<i64: 1, 1, 30, 8>}, {transform_indices = @transform_3, window_bounds = array<i64: 9, 8, 64>}, {transform_indices = @transform_4, window_bounds = array<i64: 1, 64>}, {transform_indices = @transform_5, window_bounds = array<i64: 1, 1, 28, 64>}]} {
    %c0 = arith.constant 0 : index
    %c0_0 = arith.constant 0 : index
    %c0_1 = arith.constant 0 : index
    %c0_2 = arith.constant 0 : index
    %0 = vector.load %arg3[%c0, %c0_0, %c0_1, %c0_2] : memref<1x1x30x8xbf16, #tpu.memory_space<vmem>>, vector<1x1x30x8xbf16>
    %1 = vector.shape_cast %0 : vector<1x1x30x8xbf16> to vector<30x8xbf16>
    %c0_3 = arith.constant 0 : index
    %c0_4 = arith.constant 0 : index
    %c0_5 = arith.constant 0 : index
    %c0_6 = arith.constant 0 : index
    %2 = vector.load %arg4[%c0_3, %c0_4, %c0_5, %c0_6] : memref<1x1x30x8xbf16, #tpu.memory_space<vmem>>, vector<1x1x30x8xbf16>
    %3 = vector.shape_cast %2 : vector<1x1x30x8xbf16> to vector<30x8xbf16>
    %c0_7 = arith.constant 0 : index
    %c0_8 = arith.constant 0 : index
    %c0_9 = arith.constant 0 : index
    %c0_10 = arith.constant 0 : index
    %4 = vector.load %arg5[%c0_7, %c0_8, %c0_9, %c0_10] : memref<1x1x30x8xbf16, #tpu.memory_space<vmem>>, vector<1x1x30x8xbf16>
    %5 = vector.shape_cast %4 : vector<1x1x30x8xbf16> to vector<30x8xbf16>
    %cst = arith.constant 0.000000e+00 : f32
    %6 = vector.broadcast %cst : f32 to vector<28x64xf32>
    %7 = vector.extract_strided_slice %1 {offsets = [0, 0], sizes = [28, 8], strides = [1, 1]} : vector<30x8xbf16> to vector<28x8xbf16>
    %c0_11 = arith.constant 0 : index
    %c0_12 = arith.constant 0 : index
    %c0_13 = arith.constant 0 : index
    %8 = vector.load %arg6[%c0_11, %c0_12, %c0_13] : memref<9x8x64xbf16, #tpu.memory_space<vmem>>, vector<1x8x64xbf16>
    %9 = vector.shape_cast %8 : vector<1x8x64xbf16> to vector<8x64xbf16>
    %cst_14 = arith.constant dense<0.000000e+00> : vector<28x64xf32>
    %10 = tpu.matmul %7, %9, %cst_14 {dimension_numbers = #tpu.dot_dimension_numbers<[1], [0], [0], [1], [0, 0, 1, 1], [], []>} : vector<28x8xbf16>, vector<8x64xbf16>, vector<28x64xf32> -> vector<28x64xf32>
    %11 = arith.addf %6, %10 : vector<28x64xf32>
    %12 = vector.extract_strided_slice %1 {offsets = [1, 0], sizes = [28, 8], strides = [1, 1]} : vector<30x8xbf16> to vector<28x8xbf16>
    %c1 = arith.constant 1 : index
    %c0_15 = arith.constant 0 : index
    %c0_16 = arith.constant 0 : index
    %13 = vector.load %arg6[%c1, %c0_15, %c0_16] : memref<9x8x64xbf16, #tpu.memory_space<vmem>>, vector<1x8x64xbf16>
    %14 = vector.shape_cast %13 : vector<1x8x64xbf16> to vector<8x64xbf16>
    %cst_17 = arith.constant dense<0.000000e+00> : vector<28x64xf32>
    %15 = tpu.matmul %12, %14, %cst_17 {dimension_numbers = #tpu.dot_dimension_numbers<[1], [0], [0], [1], [0, 0, 1, 1], [], []>} : vector<28x8xbf16>, vector<8x64xbf16>, vector<28x64xf32> -> vector<28x64xf32>
    %16 = arith.addf %11, %15 : vector<28x64xf32>
    %17 = vector.extract_strided_slice %1 {offsets = [2, 0], sizes = [28, 8], strides = [1, 1]} : vector<30x8xbf16> to vector<28x8xbf16>
    %c2 = arith.constant 2 : index
    %c0_18 = arith.constant 0 : index
    %c0_19 = arith.constant 0 : index
    %18 = vector.load %arg6[%c2, %c0_18, %c0_19] : memref<9x8x64xbf16, #tpu.memory_space<vmem>>, vector<1x8x64xbf16>
    %19 = vector.shape_cast %18 : vector<1x8x64xbf16> to vector<8x64xbf16>
    %cst_20 = arith.constant dense<0.000000e+00> : vector<28x64xf32>
    %20 = tpu.matmul %17, %19, %cst_20 {dimension_numbers = #tpu.dot_dimension_numbers<[1], [0], [0], [1], [0, 0, 1, 1], [], []>} : vector<28x8xbf16>, vector<8x64xbf16>, vector<28x64xf32> -> vector<28x64xf32>
    %21 = arith.addf %16, %20 : vector<28x64xf32>
    %22 = vector.extract_strided_slice %3 {offsets = [0, 0], sizes = [28, 8], strides = [1, 1]} : vector<30x8xbf16> to vector<28x8xbf16>
    %c3 = arith.constant 3 : index
    %c0_21 = arith.constant 0 : index
    %c0_22 = arith.constant 0 : index
    %23 = vector.load %arg6[%c3, %c0_21, %c0_22] : memref<9x8x64xbf16, #tpu.memory_space<vmem>>, vector<1x8x64xbf16>
    %24 = vector.shape_cast %23 : vector<1x8x64xbf16> to vector<8x64xbf16>
    %cst_23 = arith.constant dense<0.000000e+00> : vector<28x64xf32>
    %25 = tpu.matmul %22, %24, %cst_23 {dimension_numbers = #tpu.dot_dimension_numbers<[1], [0], [0], [1], [0, 0, 1, 1], [], []>} : vector<28x8xbf16>, vector<8x64xbf16>, vector<28x64xf32> -> vector<28x64xf32>
    %26 = arith.addf %21, %25 : vector<28x64xf32>
    %27 = vector.extract_strided_slice %3 {offsets = [1, 0], sizes = [28, 8], strides = [1, 1]} : vector<30x8xbf16> to vector<28x8xbf16>
    %c4 = arith.constant 4 : index
    %c0_24 = arith.constant 0 : index
    %c0_25 = arith.constant 0 : index
    %28 = vector.load %arg6[%c4, %c0_24, %c0_25] : memref<9x8x64xbf16, #tpu.memory_space<vmem>>, vector<1x8x64xbf16>
    %29 = vector.shape_cast %28 : vector<1x8x64xbf16> to vector<8x64xbf16>
    %cst_26 = arith.constant dense<0.000000e+00> : vector<28x64xf32>
    %30 = tpu.matmul %27, %29, %cst_26 {dimension_numbers = #tpu.dot_dimension_numbers<[1], [0], [0], [1], [0, 0, 1, 1], [], []>} : vector<28x8xbf16>, vector<8x64xbf16>, vector<28x64xf32> -> vector<28x64xf32>
    %31 = arith.addf %26, %30 : vector<28x64xf32>
    %32 = vector.extract_strided_slice %3 {offsets = [2, 0], sizes = [28, 8], strides = [1, 1]} : vector<30x8xbf16> to vector<28x8xbf16>
    %c5 = arith.constant 5 : index
    %c0_27 = arith.constant 0 : index
    %c0_28 = arith.constant 0 : index
    %33 = vector.load %arg6[%c5, %c0_27, %c0_28] : memref<9x8x64xbf16, #tpu.memory_space<vmem>>, vector<1x8x64xbf16>
    %34 = vector.shape_cast %33 : vector<1x8x64xbf16> to vector<8x64xbf16>
    %cst_29 = arith.constant dense<0.000000e+00> : vector<28x64xf32>
    %35 = tpu.matmul %32, %34, %cst_29 {dimension_numbers = #tpu.dot_dimension_numbers<[1], [0], [0], [1], [0, 0, 1, 1], [], []>} : vector<28x8xbf16>, vector<8x64xbf16>, vector<28x64xf32> -> vector<28x64xf32>
    %36 = arith.addf %31, %35 : vector<28x64xf32>
    %37 = vector.extract_strided_slice %5 {offsets = [0, 0], sizes = [28, 8], strides = [1, 1]} : vector<30x8xbf16> to vector<28x8xbf16>
    %c6 = arith.constant 6 : index
    %c0_30 = arith.constant 0 : index
    %c0_31 = arith.constant 0 : index
    %38 = vector.load %arg6[%c6, %c0_30, %c0_31] : memref<9x8x64xbf16, #tpu.memory_space<vmem>>, vector<1x8x64xbf16>
    %39 = vector.shape_cast %38 : vector<1x8x64xbf16> to vector<8x64xbf16>
    %cst_32 = arith.constant dense<0.000000e+00> : vector<28x64xf32>
    %40 = tpu.matmul %37, %39, %cst_32 {dimension_numbers = #tpu.dot_dimension_numbers<[1], [0], [0], [1], [0, 0, 1, 1], [], []>} : vector<28x8xbf16>, vector<8x64xbf16>, vector<28x64xf32> -> vector<28x64xf32>
    %41 = arith.addf %36, %40 : vector<28x64xf32>
    %42 = vector.extract_strided_slice %5 {offsets = [1, 0], sizes = [28, 8], strides = [1, 1]} : vector<30x8xbf16> to vector<28x8xbf16>
    %c7 = arith.constant 7 : index
    %c0_33 = arith.constant 0 : index
    %c0_34 = arith.constant 0 : index
    %43 = vector.load %arg6[%c7, %c0_33, %c0_34] : memref<9x8x64xbf16, #tpu.memory_space<vmem>>, vector<1x8x64xbf16>
    %44 = vector.shape_cast %43 : vector<1x8x64xbf16> to vector<8x64xbf16>
    %cst_35 = arith.constant dense<0.000000e+00> : vector<28x64xf32>
    %45 = tpu.matmul %42, %44, %cst_35 {dimension_numbers = #tpu.dot_dimension_numbers<[1], [0], [0], [1], [0, 0, 1, 1], [], []>} : vector<28x8xbf16>, vector<8x64xbf16>, vector<28x64xf32> -> vector<28x64xf32>
    %46 = arith.addf %41, %45 : vector<28x64xf32>
    %47 = vector.extract_strided_slice %5 {offsets = [2, 0], sizes = [28, 8], strides = [1, 1]} : vector<30x8xbf16> to vector<28x8xbf16>
    %c8 = arith.constant 8 : index
    %c0_36 = arith.constant 0 : index
    %c0_37 = arith.constant 0 : index
    %48 = vector.load %arg6[%c8, %c0_36, %c0_37] : memref<9x8x64xbf16, #tpu.memory_space<vmem>>, vector<1x8x64xbf16>
    %49 = vector.shape_cast %48 : vector<1x8x64xbf16> to vector<8x64xbf16>
    %cst_38 = arith.constant dense<0.000000e+00> : vector<28x64xf32>
    %50 = tpu.matmul %47, %49, %cst_38 {dimension_numbers = #tpu.dot_dimension_numbers<[1], [0], [0], [1], [0, 0, 1, 1], [], []>} : vector<28x8xbf16>, vector<8x64xbf16>, vector<28x64xf32> -> vector<28x64xf32>
    %51 = arith.addf %46, %50 : vector<28x64xf32>
    %c0_39 = arith.constant 0 : index
    %c0_40 = arith.constant 0 : index
    %52 = vector.load %arg7[%c0_39, %c0_40] : memref<1x64xf32, #tpu.memory_space<vmem>>, vector<1x64xf32>
    %53 = vector.broadcast %52 : vector<1x64xf32> to vector<28x64xf32>
    %54 = arith.addf %51, %53 : vector<28x64xf32>
    %cst_41 = arith.constant 0.000000e+00 : f32
    %55 = vector.broadcast %cst_41 : f32 to vector<28x64xf32>
    %56 = arith.maximumf %54, %55 : vector<28x64xf32>
    %c0_42 = arith.constant 0 : index
    %c0_43 = arith.constant 0 : index
    %c0_44 = arith.constant 0 : index
    %c0_45 = arith.constant 0 : index
    %57 = vector.load %arg8[%c0_42, %c0_43, %c0_44, %c0_45] : memref<1x1x28x64xf32, #tpu.memory_space<vmem>>, vector<1x1x28x64xf32>
    %58 = vector.shape_cast %57 : vector<1x1x28x64xf32> to vector<28x64xf32>
    %59 = vector.shape_cast %56 : vector<28x64xf32> to vector<1x1x28x64xf32>
    tpu.vector_store %arg8[%c0_42, %c0_43, %c0_44, %c0_45], %59 {strides = array<i32>} : memref<1x1x28x64xf32, #tpu.memory_space<vmem>>, vector<1x1x28x64xf32>,
    return
  }
  func.func @transform_0(%arg0: i32, %arg1: i32, %arg2: i32) -> (i32, i32, i32, i32) {
    %c0_i32 = arith.constant 0 : i32
    %0 = arith.addi %arg2, %c0_i32 : i32
    %c0_i32_0 = arith.constant 0 : i32
    %c0_i32_1 = arith.constant 0 : i32
    %c0_i32_2 = arith.constant 0 : i32
    return %arg1, %0, %c0_i32_0, %c0_i32_1 : i32, i32, i32, i32
  }
  func.func @transform_1(%arg0: i32, %arg1: i32, %arg2: i32) -> (i32, i32, i32, i32) {
    %c1_i32 = arith.constant 1 : i32
    %0 = arith.addi %arg2, %c1_i32 : i32
    %c0_i32 = arith.constant 0 : i32
    %c0_i32_0 = arith.constant 0 : i32
    %c0_i32_1 = arith.constant 0 : i32
    return %arg1, %0, %c0_i32, %c0_i32_0 : i32, i32, i32, i32
  }
  func.func @transform_2(%arg0: i32, %arg1: i32, %arg2: i32) -> (i32, i32, i32, i32) {
    %c2_i32 = arith.constant 2 : i32
    %0 = arith.addi %arg2, %c2_i32 : i32
    %c0_i32 = arith.constant 0 : i32
    %c0_i32_0 = arith.constant 0 : i32
    %c0_i32_1 = arith.constant 0 : i32
    return %arg1, %0, %c0_i32, %c0_i32_0 : i32, i32, i32, i32
  }
  func.func @transform_3(%arg0: i32, %arg1: i32, %arg2: i32) -> (i32, i32, i32) {
    %c0_i32 = arith.constant 0 : i32
    %c0_i32_0 = arith.constant 0 : i32
    %c0_i32_1 = arith.constant 0 : i32
    return %c0_i32, %c0_i32_0, %arg0 : i32, i32, i32
  }
  func.func @transform_4(%arg0: i32, %arg1: i32, %arg2: i32) -> (i32, i32) {
    %c0_i32 = arith.constant 0 : i32
    %c0_i32_0 = arith.constant 0 : i32
    return %c0_i32, %arg0 : i32, i32
  }
  func.func @transform_5(%arg0: i32, %arg1: i32, %arg2: i32) -> (i32, i32, i32, i32) {
    %c0_i32 = arith.constant 0 : i32
    %c0_i32_0 = arith.constant 0 : i32
    return %arg1, %arg2, %c0_i32, %arg0 : i32, i32, i32, i32
  }
}

</mosaic_0001>

<bundles_post_ra>
// kernel: tpu_custom_call.1
= control target key start
LH: loop header
LB: loop body
LE: loop exit
PB: predicated region body
PF: predicated region fallthrough
CT: control target
= control target key end

     0   :  { %s1540_s18 = smov 0   ;;  %s1542_s19 = smov 0   ;;  %s1697_s0 = inlined_call_operand.vmem [shape: bf16[2,30,30,8], index: 0, kind: input, shape index: {}]   ;;  %s1698_s1 = inlined_call_operand.vmem [shape: bf16[2,30,30,8], index: 1, kind: input, shape index: {}]   ;;  %s1699_s2 = inlined_call_operand.vmem [shape: bf16[2,30,30,8], index: 2, kind: input, shape index: {}]   ;;  %s1700_s3 = inlined_call_operand.vmem [shape: bf16[9,8,64], index: 3, kind: input, shape index: {}]   ;;  %s1701_s4 = inlined_call_operand.vmem [shape: f32[1,64], index: 4, kind: input, shape index: {}]   ;;  %s1702_s5 = inlined_call_operand.vmem [shape: f32[2,28,28,64], index: 5, kind: output, shape index: {}]  }
   0x1   :  { %s1544_s20 = smov 0   ;;  %s1546_s21 = smov 0  }
   0x2   :  { %s1548_s22 = smov 0  }
   0x3 LB: > { %s27_s23 = sadd.s32 1, %s1500_s20  ;;  %s30_s24 = sadd.s32 1, %s1504_s21  ;;  %s1508_s22 = sphi %s1548_s22, %s15_s22   ;;  %s1504_s21 = sphi %s1546_s21, %s1706_s21   ;;  %s1500_s20 = sphi %s1544_s20, %s1705_s20   ;;  %s1496_s19 = sphi %s1542_s19, %s1704_s19   ;;  %s1492_s18 = sphi %s1540_s18, %s1703_s18  }
   0x4   : > { %p28_p0 = scmp.ge.s32.totalorder %s27_s23, 28  ;;  %p1256_p1 = scmp.ge.s32.totalorder %s1508_s22, 1 }
   0x5   : > { %p273_p2 = scmp.lt.s32.totalorder %s1508_s22, 57 }
   0x6   : > { %s1708_s23 = smov (%p28_p0, %s27_s23), 0  ;;  %s1710_s24 = smov (!%p28_p0, %s30_s24), %s1504_s21 }
   0x7   : > { %p274_p3 = pnand %p1256_p1, %p273_p2  ;;  %p32_p4 = scmp.ge.s32.totalorder %s1710_s24, 2 }
   0x8   : > { %vm438_vm0 = vcmask (!%p274_p3), 1043456   ;;  %v1280_v0 = vld [vmem:[%s1700_s3 + $0x10] sm:$0xf] (!%p274_p3)  ;;  %v1265_v1 = vld [vmem:[%s1700_s3 + $0x4] sm:$0xf] (!%p274_p3)  ;;  %p339_p5 = scmp.lt.s32.totalorder (!%p274_p3), %s1496_s19, 1 }
   0x9   : > { %s1712_s24 = smov (%p32_p4, %s1710_s24), 0  ;;  %277 = sbr.rel (%p274_p3) target bundleno = 304 (0x130), region = 40 }
   0xa   : > { %1417 = vmatprep.subr.msk.bf16.mxu0 (!%p274_p3), %vm438_vm0, %v1280_v0  ;;  %1413 = vmatprep.subr.msk.bf16.mxu1 (!%p274_p3), %vm438_vm0, %v1265_v1  ;;  %v711_v2 = vsel (!%p274_p3), %vm438_vm0, %v1280_v0, 0  ;;  %v440_v3 = vsel (!%p274_p3), %vm438_vm0, %v1265_v1, 0  ;;  %p341_p6 = scmp.lt.s32.totalorder (!%p274_p3), %s1492_s18, 29  ;;  %v1283_v4 = vld [vmem:[%s1700_s3 + $0x14] sm:$0xf] (!%p274_p3)  ;;  %s348_s10 = sadd.s32 (!%p274_p3), 1, %s1492_s18 }
   0xb   : > { %1352 = vmatpush3.bf16.msra.mxu0 (!%p274_p3), %v711_v2  ;;  %1328 = vmatpush3.bf16.msra.mxu1 (!%p274_p3), %v440_v3  ;;  %v402_v5 = vld [vmem:[%s1700_s3] sm:$0xf] (!%p274_p3)  ;;  %p351_p7 = scmp.lt.s32.totalorder (!%p274_p3), %s348_s10, 29  ;;  %s359_s13 = sadd.s32 (!%p274_p3), 2, %s1492_s18  ;;  %vm415_vm1 = vsmask.f32 (!%p274_p3), 7424 }
   0xc   : > { %1418 = vmatprep.subr.msk.bf16.mxu0 (!%p274_p3), %vm438_vm0, %v1283_v4  ;;  %1414 = vmatprep.subr.msk.bf16.mxu1 (!%p274_p3), %vm438_vm0, %v402_v5  ;;  %p362_p8 = scmp.lt.s32.totalorder (!%p274_p3), %s359_s13, 29  ;;  %vm431_vm2 = vcmask (!%p274_p3), 64512   ;;  %v496_v18 = vsel (!%p274_p3), %vm438_vm0, %v402_v5, 0  ;;  %v1272_v20 = vld [vmem:[%s1700_s3 + $0x8] sm:$0xf] (!%p274_p3)  ;;  %vm549_vm3 = vcmask (!%p274_p3), 1046528  }
   0xd   : > { %v778_v32 = vsel (!%p274_p3), %vm438_vm0, %v1283_v4, 0  ;;  %v1286_v34 = vld [vmem:[%s1700_s3 + $0x18] sm:$0xf] (!%p274_p3)  ;;  %v560_v37 = vsel (!%p274_p3), %vm438_vm0, %v1272_v20, 0  ;;  %v1275_v39 = vld [vmem:[%s1700_s3 + $0xc] sm:$0xf] (!%p274_p3) }
   0xe   : > { %v852_v41 = vsel (!%p274_p3), %vm438_vm0, %v1286_v34, 0  ;;  %v1291_v43 = vld [vmem:[%s1700_s3 + $0x1c] sm:$0xf] (!%p274_p3)  ;;  %v634_v48 = vsel (!%p274_p3), %vm438_vm0, %v1275_v39, 0  ;;  %v1294_v53 = vld [vmem:[%s1700_s3 + $0x20] sm:$0xf] (!%p274_p3) }
   0xf   : > { %v929_v51 = vsel (!%p274_p3), %vm438_vm0, %v1291_v43, 0  ;;  %v996_v58 = vsel (!%p274_p3), %vm438_vm0, %v1294_v53, 0  ;;  %p379_p9 = scmp.lt.s32.totalorder (!%p274_p3), %s1492_s18, 27  ;;  %v1297_v1 = vld [vmem:[%s1701_s4] ss:$0 sm:$0xff] (!%p274_p3)  ;;  %vm1066_vm4 = vcmask (!%p274_p3), 523264  }
  0x10   : > { %s1714_s19 = smov (!%p339_p5, %s1496_s19), 1  ;;  %s1716_s10 = smov (!%p351_p7, %s348_s10), 29  ;;  %vm1070_vm5 = vcmask 519168  }
  0x11   : > { %s342_s8 = scalar_select %p341_p6, %s1492_s18, 29 }
  0x12   : > { %s1422_s9 = smul.u32 120, %s1714_s19  ;;  %s1718_s13 = smov (!%p362_p8, %s359_s13), 29 }
  0x13   : > { %s1257_s11 = sshll.u32 %s342_s8, 2  ;;  %s1259_s25 = sshll.u32 %s1716_s10, 2 }
  0x14   : > { %s345_s12 = sadd.s32 %s1422_s9, %s1257_s11  ;;  %s355_s26 = sadd.s32 %s1422_s9, %s1259_s25 }
  0x15   : > { %s1258_s14 = sshll.u32 %s345_s12, 2  ;;  %s1261_s27 = sshll.u32 %s1718_s13, 2 }
  0x16   : > { %s347_s17 = scalar_lea.vmem %s1697_s0, %s1258_s14  ;;  %s1260_s28 = sshll.u32 %s355_s26, 2 }
  0x17   : > { %v1464_v6 = vld [vmem:[%s347_s17] sm:$0xff]   ;;  %v1600_v7 = vld [vmem:[%s347_s17 + $0x8] sm:$0x7f]   ;;  %s366_s29 = sadd.s32 %s1422_s9, %s1261_s27  ;;  %s357_s7 = scalar_lea.vmem %s1698_s1, %s1260_s28 }
  0x18   : > { %v417_v8 = vshrl.u32 %v1464_v6, 16  ;;  %v419_v9 = vshll.u32 %v1464_v6, 16  ;;  %v424_v10 = vshll.u32 %v1600_v7, 16  ;;  %v428_v11 = vshrl.u32 %v1600_v7, 16  ;;  %s1262_s8 = sshll.u32 %s366_s29, 2  ;;  %v1466_v16 = vld [vmem:[%s357_s7] sm:$0xff]  }
  0x19   : > { %v1607_v17 = vld [vmem:[%s357_s7 + $0x8] sm:$0x7f]   ;;  %s1613_s12 = scalar_lea.vmem %s1699_s2, %s1262_s8  ;;  %v691_v21 = vshrl.u32 %v1466_v16, 16  ;;  %v693_v22 = vshll.u32 %v1466_v16, 16  ;;  %v768_v27 = vrot.slane %v1466_v16, 1  ;;  %v550_v35 = vrot.slane %v1464_v6, 1 }
  0x1a   : > { %v421_v12 = vrot.slane %v419_v9, 1  ;;  %v426_v13 = vrot.slane %v424_v10, 1  ;;  %v697_v23 = vshll.u32 %v1607_v17, 16  ;;  %v701_v24 = vshrl.u32 %v1607_v17, 16  ;;  %v1468_v40 = vld [vmem:[%s1613_s12] sm:$0xff]   ;;  %s1720_s18 = smov (!%p379_p9, %s1492_s18), 27 }
  0x1b   : > { %v695_v25 = vrot.slane %v693_v22, 1  ;;  %v769_v28 = vrot.slane %v1607_v17, 1  ;;  %v551_v36 = vrot.slane %v1600_v7, 1  ;;  %v911_v42 = vshll.u32 %v1468_v40, 16  ;;  %v1469_v44 = vld [vmem:[%s1613_s12 + $0x8] sm:$0x7f]  }
  0x1c   : > { %v422_v14 = vor.u32 %v421_v12, %v417_v8  ;;  %v430_v15 = vor.u32 %v428_v11, %v426_v13  ;;  %v699_v26 = vrot.slane %v697_v23, 1  ;;  %v909_v45 = vshrl.u32 %v1468_v40, 16  ;;  %s1423_s29 = smul.u32 112, %s1714_s19  ;;  %s1263_s30 = sshll.u32 %s1720_s18, 2 }
  0x1d   : > { %v696_v29 = vor.u32 %v695_v25, %v691_v21  ;;  %v770_v33 = vsel %vm549_vm3, %v768_v27, %v769_v28  ;;  %v552_v38 = vsel %vm549_vm3, %v550_v35, %v551_v36  ;;  %v913_v46 = vrot.slane %v911_v42, 1 }
  0x1e   : > { %v427_v19 = vsel %vm415_vm1, %v422_v14, %v426_v13  ;;  %v703_v30 = vor.u32 %v701_v24, %v699_v26  ;;  %v915_v47 = vshll.u32 %v1469_v44, 16  ;;  %v919_v54 = vshrl.u32 %v1469_v44, 16  ;;  %s386_s6 = sadd.s32 %s1423_s29, %s1263_s30 }
  0x1f   : > { %1329 = vmatprep.mubr.msk.bf16.mxu1 %vm431_vm2, %v427_v19  ;;  %v700_v31 = vsel %vm415_vm1, %v696_v29, %v699_v26  ;;  %v914_v49 = vor.u32 %v913_v46, %v909_v45  ;;  %v986_v55 = vrot.slane %v1468_v40, 1  ;;  %v987_v56 = vrot.slane %v1469_v44, 1  ;;  %s1264_s10 = sshll.u32 %s386_s6, 3 }
  0x20   : > { %1330 = vmatmul.mubr.msk.bf16.vlgmr.msra.gmra.mrb[0].mxu1 %vm431_vm2, %v430_v15  ;;  %1353 = vmatprep.mubr.msk.bf16.mxu0 %vm431_vm2, %v700_v31  ;;  %v917_v50 = vrot.slane %v915_v47, 1  ;;  %s388_s9 = scalar_lea.vmem %s1702_s5, %s1264_s10 }
  0x21   : > { %1334 = vmatpush3.bf16.msra.mxu1 %v496_v18  ;;  %1335 = vmatprep.mubr.msk.bf16.mxu1 %vm431_vm2, %v1464_v6  ;;  %v988_v59 = vsel %vm549_vm3, %v986_v55, %v987_v56 }
  0x22   : > { %1415 = vmatprep.subr.msk.bf16.mxu1 %vm438_vm0, %v1272_v20  ;;  %1354 = vmatmul.mubr.msk.bf16.vlgmr.msra.gmra.mrb[0].mxu0 %vm431_vm2, %v703_v30  ;;  %v918_v52 = vsel %vm415_vm1, %v914_v49, %v917_v50  ;;  %v921_v57 = vor.u32 %v919_v54, %v917_v50 }
  0x23   : > { %1358 = vmatpush3.bf16.msra.mxu0 %v778_v32  ;;  %1359 = vmatprep.mubr.msk.bf16.mxu0 %vm431_vm2, %v770_v33 }
  0x24   : > { %1419 = vmatprep.subr.msk.bf16.mxu0 %vm438_vm0, %v1286_v34 }
  0x2c   : > { %1336 = vmatmul.mubr.msk.bf16.vlgmr.msra.gmra.mrb[0].mxu1 %vm431_vm2, %v1600_v7 }
  0x2d   : > { %1340 = vmatpush3.bf16.msra.mxu1 %v560_v37  ;;  %1341 = vmatprep.mubr.msk.bf16.mxu1 %vm431_vm2, %v552_v38 }
  0x2e   : > { %1416 = vmatprep.subr.msk.bf16.mxu1 %vm438_vm0, %v1275_v39  ;;  %1360 = vmatmul.mubr.msk.bf16.vlgmr.msra.gmra.mrb[0].mxu0 %vm431_vm2, %v769_v28 }
  0x2f   : > { %1364 = vmatpush3.bf16.msra.mxu0 %v852_v41  ;;  %1365 = vmatprep.mubr.msk.bf16.mxu0 %vm431_vm2, %v1468_v40 }
  0x30   : > { %1420 = vmatprep.subr.msk.bf16.mxu0 %vm438_vm0, %v1291_v43 }
  0x38   : > { %1342 = vmatmul.mubr.msk.bf16.vlgmr.msra.gmra.mrb[0].mxu1 %vm431_vm2, %v551_v36 }
  0x39   : > { %1346 = vmatpush3.bf16.msra.mxu1 %v634_v48  ;;  %1347 = vmatprep.mubr.msk.bf16.mxu1 %vm431_vm2, %v1466_v16 }
  0x3a   : > { %1366 = vmatmul.mubr.msk.bf16.vlgmr.msra.gmra.mrb[0].mxu0 %vm431_vm2, %v1469_v44 }
  0x3b   : > { %1370 = vmatpush3.bf16.msra.mxu0 %v929_v51  ;;  %1371 = vmatprep.mubr.msk.bf16.mxu0 %vm431_vm2, %v918_v52 }
  0x3c   : > { %1421 = vmatprep.subr.msk.bf16.mxu0 %vm438_vm0, %v1294_v53 }
  0x44   : > { %1348 = vmatmul.mubr.msk.bf16.vlgmr.msra.gmra.mrb[0].mxu1 %vm431_vm2, %v1607_v17 }
  0x46   : > { %1372 = vmatmul.mubr.msk.bf16.vlgmr.msra.gmra.mrb[0].mxu0 %vm431_vm2, %v921_v57 }
  0x47   : > { %1376 = vmatpush3.bf16.msra.mxu0 %v996_v58  ;;  %1377 = vmatprep.mubr.msk.bf16.mxu0 %vm431_vm2, %v988_v59 }
  0x52   : > { %1378 = vmatmul.mubr.msk.bf16.vlgmr.msra.gmra.mrb[0].mxu0 %vm431_vm2, %v987_v56 }
 0x117   : > { %v1349_v60 = vpop.f32.mrb[0].mxu1 }
 0x118   : > { %v670_v61 = vpop.f32.mrb[1].mxu1 }
 0x119   : > { %v1350_v62 = vpop.f32.mrb[2].mxu1 }
 0x11a   : > { %v673_v63 = vpop.f32.mrb[3].mxu1 }
 0x125   : > { %v1379_v0 = vpop.f32.mrb[0].mxu0 }
 0x126   : > { %v1381_v2 = vadd.f32 %v1379_v0, %v1349_v60  ;;  %v1032_v3 = vpop.f32.mrb[1].mxu0 }
 0x127   : > { %v1382_v4 = vadd.f32 %v1032_v3, %v670_v61  ;;  %v1380_v5 = vpop.f32.mrb[2].mxu0 }
 0x128   : > { %v1060_v6 = vadd.f32 %v1381_v2, %v1297_v1  ;;  %v1383_v7 = vadd.f32 %v1380_v5, %v1350_v62  ;;  %v1035_v8 = vpop.f32.mrb[3].mxu0 }
 0x129   : > { %v1058_v9 = vadd.f32 %v1382_v4, %v1297_v1  ;;  %v1384_v10 = vadd.f32 %v1035_v8, %v673_v63 }
 0x12a   : > { %v1064_v11 = vmax.f32 %v1060_v6, 0.0  ;;  %v1061_v12 = vadd.f32 %v1383_v7, %v1297_v1 }
 0x12b   : > { %v1062_v13 = vmax.f32 %v1058_v9, 0.0  ;;  %v1059_v14 = vadd.f32 %v1384_v10, %v1297_v1 }
 0x12c   : > { %1069 = vst.msk [vmem:[%s388_s9 + $0x10] sm:$0xff] %vm1066_vm4, %v1064_v11  ;;  %v1065_v15 = vmax.f32 %v1061_v12, 0.0 }
 0x12d   : > { %1067 = vst.msk [vmem:[%s388_s9] sm:$0xff] %vm1066_vm4, %v1062_v13  ;;  %v1063_v16 = vmax.f32 %v1059_v14, 0.0 }
 0x12e   : > { %1071 = vst.msk [vmem:[%s388_s9 + $0x18] sm:$0xf] %vm1070_vm5, %v1065_v15 }
 0x12f   : > { %1068 = vst.msk [vmem:[%s388_s9 + $0x8] sm:$0xff] %vm1066_vm4, %v1063_v16 }
 0x130 PF: > { %s15_s22 = sadd.s32 1, %s1508_s22   ;;  %s1703_s18 = smov %s1500_s20 }
 0x131   : > { %p12_p10 = scmp.ge.s32.totalorder %s15_s22, 58   ;;  %s1704_s19 = smov %s1504_s21 }
 0x132   : > { %s1705_s20 = smov %s1708_s23  ;;  %s1706_s21 = smov %s1712_s24 }
 0x133   :  { %14 = sbr.rel (!%p12_p10) target bundleno = 3 (0x3), region = 90 }

</bundles_post_ra>
